<compile_context>
chip_gen: v5e
topology: v5e:2x2
jax: 0.10.0
libtpu: 0.0.40
codegen_flags: <defaults>
</compile_context>

<pallas_src>
import jax
import jax.numpy as jnp
from jax.experimental import pallas as pl
from jax.experimental.pallas import tpu as pltpu

DT = 0.05      # RosieDx.dt
LANE = 128     # vreg lane width
SUB = 8        # vreg sublane count (for 32-bit dtypes)


def _round_up(n, m):
    return ((n + m - 1) // m) * m


def rosie_dx_kernel(xu_ref, o_ref):
    # xu_ref: (6, tr, 128) VMEM tile, component-major: rho, alpha, beta, usx, usy, uav.
    # o_ref:  (3, tr, 128) VMEM tile, component-major: new_rho, new_alpha, new_beta.
    rho = xu_ref[0]
    alpha = xu_ref[1]
    beta = xu_ref[2]
    usx = xu_ref[3]
    usy = xu_ref[4]
    uav = xu_ref[5]

    # TODO(synk): sin/cos lower to VPU range-reduction + polynomials; sharing
    # the range reduction between the two would trim VALU work on v7x (hidden
    # under HBM on v5e/v6e).
    c = jnp.cos(alpha)
    s = jnp.sin(alpha)

    # EUP vrcp (co-issues in its own VLIW slot) + one Newton-Raphson step to
    # recover ~full f32 precision without the VALU divide path.
    inv_rho = pl.reciprocal(rho, approx=True)
    inv_rho = inv_rho * (2.0 - rho * inv_rho)

    c_r = c * inv_rho
    s_r = s * inv_rho
    a = s_r * usx - c_r * usy        # shared between alpha_dot / beta_dot

    # Full-tile, lane+sublane-dense stores.
    o_ref[0, :, :] = rho - (c * usx + s * usy) * DT
    o_ref[1, :, :] = alpha + (a - uav) * DT
    o_ref[2, :, :] = beta - a * DT


def rosie_dx(x, u, *, tile_rows=1024, min_pallas_batch=4096,
             component_major_out=False):
    """Pallas implementation of RosieDx.forward.

    x, u: (B, 3) or (3,).

    tile_rows: max rows (of 128 batch lanes each) per grid step.
    min_pallas_batch: below this batch size the fused XLA expression is used
      (for MPC-sized batches the fixed layout/launch cost dominates).
    component_major_out: if True (and not squeezed), return the state as
      (3, B) component-major, skipping the back-transpose entirely.
    """
    squeeze = x.ndim == 1
    if squeeze:
        x = x[None, :]
        u = u[None, :]
    assert x.ndim == 2 and u.ndim == 2
    assert x.shape[0] == u.shape[0]
    assert x.shape[1] == 3 and u.shape[1] == 3

    B = x.shape[0]
    dtype = x.dtype
    assert jnp.issubdtype(dtype, jnp.floating)

    # Fast path: small batches are cheaper as one fused XLA elementwise expr.
    if B < min_pallas_batch:
        state = rosie_dx_ref(x, u)
        if squeeze:
            return state[0]
        return state.T if component_major_out else state

    itemsize = jnp.dtype(dtype).itemsize
    # Minimum sublane quantum per dtype width (f32: 8, bf16: 16, 8-bit: 32).
    sub_q = SUB * max(1, 4 // itemsize)
    tile_rows = _round_up(max(tile_rows, sub_q), sub_q)

    # Rows of 128 batch lanes; only a tiny quantum of row padding (<= sub_q-1).
    R = _round_up(pl.cdiv(B, LANE), sub_q)
    Bp = R * LANE
    # Cap the tile so the grid keeps >= ~4 steps (pipelining + v7x 2-TC split);
    # the last block may be ragged (Pallas masks the writeback, and reads of
    # stale VMEM only feed discarded lanes).
    tr = min(tile_rows, _round_up(max(R // 4, sub_q), sub_q))
    grid = (pl.cdiv(R, tr),)

    # Single pad + component-major repack for BOTH operands. Pad value 1.0
    # keeps 1/rho finite on the discarded pad lanes.
    # TODO(synk): upstream MPC code should carry state/control component-major
    # so this repack (one extra HBM pass) disappears entirely.
    xu = jnp.concatenate((x, u), axis=1)                         # (B, 6)
    xu = jnp.pad(xu, ((0, Bp - B), (0, 0)), constant_values=1.0)  # (Bp, 6)
    xu_c = xu.T.reshape(6, R, LANE)                               # (6, R, 128)

    # Per-step VMEM: (6 + 3) * tr * 128 * itemsize, double-buffered. Only set
    # an explicit limit when the default scoped budget (16 MiB on v5e) is
    # too small for the chosen tile.
    step_bytes = (6 + 3) * tr * LANE * itemsize
    cp_kwargs = dict(dimension_semantics=("parallel",))
    if 2 * step_bytes > 14 * 1024 * 1024:
        cp_kwargs["vmem_limit_bytes"] = int(2 * step_bytes + (4 << 20))

    cost = pl.CostEstimate(
        flops=16 * Bp,
        transcendentals=3 * Bp,
        bytes_accessed=(6 + 3) * Bp * itemsize,
    )

    out_c = pl.pallas_call(
        rosie_dx_kernel,
        out_shape=jax.ShapeDtypeStruct((3, R, LANE), dtype),
        grid=grid,
        in_specs=[
            pl.BlockSpec((6, tr, LANE), lambda i: (0, i, 0)),
        ],
        out_specs=pl.BlockSpec((3, tr, LANE), lambda i: (0, i, 0)),
        compiler_params=pltpu.CompilerParams(**cp_kwargs),
        cost_estimate=cost,
    )(xu_c)

    state_cm = out_c.reshape(3, Bp)[:, :B]   # (3, B) component-major
    if squeeze:
        return state_cm[:, 0]
    return state_cm if component_major_out else state_cm.T


def rosie_dx_ref(x, u):
    """Pure-JAX reference (also the small-batch fast path)."""
    rho, alpha, beta = x[:, 0], x[:, 1], x[:, 2]
    usx, usy, uav = u[:, 0], u[:, 1], u[:, 2]
    c, s = jnp.cos(alpha), jnp.sin(alpha)
    rho_dot = -c * usx - s * usy
    alpha_dot = s / rho * usx - c / rho * usy - uav
    beta_dot = -s / rho * usx + c / rho * usy
    return jnp.stack(
        (rho + rho_dot * DT, alpha + alpha_dot * DT, beta + beta_dot * DT), axis=1
    )


if __name__ == "__main__":
    key = jax.random.PRNGKey(0)
    kx, ku = jax.random.split(key)

    # Small shapes consistent with the module's (B, 3) state/control.
    B = 8
    # rho strictly positive / away from zero, like a polar-coordinate state.
    x = jax.random.uniform(kx, (B, 3), jnp.float32, minval=0.5, maxval=2.0)
    u = jax.random.normal(ku, (B, 3), jnp.float32)
    ref = rosie_dx_ref(x, u)

    # Force the Pallas path even at tiny B (default dispatch would use the
    # fused-XLA fast path here).
    out = jax.block_until_ready(rosie_dx(x, u, min_pallas_batch=0))
    assert out.shape == (B, 3)
    assert jnp.allclose(out, ref, atol=1e-5, rtol=1e-5)

    # Default dispatch (small B -> fast path) and the 1-D (squeeze) path.
    out_fast = jax.block_until_ready(rosie_dx(x, u))
    assert jnp.allclose(out_fast, ref, atol=1e-6, rtol=1e-6)
    out1 = jax.block_until_ready(rosie_dx(x[0], u[0], min_pallas_batch=0))
    assert out1.shape == (3,)
    assert jnp.allclose(out1, ref[0], atol=1e-5, rtol=1e-5)

    # Multi-step grid with a ragged last block (B=5000 -> R=40, tr=16 -> 3 steps,
    # last step covers only 8 of 16 rows).
    kx2, ku2 = jax.random.split(jax.random.PRNGKey(1))
    B2 = 5000
    x2 = jax.random.uniform(kx2, (B2, 3), jnp.float32, minval=0.5, maxval=2.0)
    u2 = jax.random.normal(ku2, (B2, 3), jnp.float32)
    ref2 = rosie_dx_ref(x2, u2)
    out2 = jax.block_until_ready(
        rosie_dx(x2, u2, tile_rows=16, min_pallas_batch=0))
    assert out2.shape == (B2, 3)
    assert jnp.allclose(out2, ref2, atol=1e-5, rtol=1e-5)

    # Component-major output path (no back-transpose).
    out_cm = jax.block_until_ready(
        rosie_dx(x2, u2, min_pallas_batch=0, component_major_out=True))
    assert out_cm.shape == (3, B2)
    assert jnp.allclose(out_cm.T, ref2, atol=1e-5, rtol=1e-5)

    print("KERNEL_OK")
</pallas_src>

<mosaic_0001>
module attributes {stable_mosaic.version = 11 : i64} {
  func.func @rosie_dx_kernel(%arg0: i32, %arg1: memref<6x8x128xf32, #tpu.memory_space<vmem>>, %arg2: memref<3x8x128xf32, #tpu.memory_space<vmem>>) attributes {dimension_semantics = [#tpu.dimension_semantics<parallel>], iteration_bounds = array<i64: 1>, scalar_prefetch = 0 : i64, scratch_operands = 0 : i64, tpu.core_type = #tpu.core_type<tc>, window_params = [{transform_indices = @transform_0, window_bounds = array<i64: 6, 8, 128>}, {transform_indices = @transform_1, window_bounds = array<i64: 3, 8, 128>}]} {
    %c0 = arith.constant 0 : index
    %c0_0 = arith.constant 0 : index
    %c0_1 = arith.constant 0 : index
    %0 = vector.load %arg1[%c0, %c0_0, %c0_1] : memref<6x8x128xf32, #tpu.memory_space<vmem>>, vector<1x8x128xf32>
    %1 = vector.shape_cast %0 : vector<1x8x128xf32> to vector<8x128xf32>
    %c1 = arith.constant 1 : index
    %c0_2 = arith.constant 0 : index
    %c0_3 = arith.constant 0 : index
    %2 = vector.load %arg1[%c1, %c0_2, %c0_3] : memref<6x8x128xf32, #tpu.memory_space<vmem>>, vector<1x8x128xf32>
    %3 = vector.shape_cast %2 : vector<1x8x128xf32> to vector<8x128xf32>
    %c2 = arith.constant 2 : index
    %c0_4 = arith.constant 0 : index
    %c0_5 = arith.constant 0 : index
    %4 = vector.load %arg1[%c2, %c0_4, %c0_5] : memref<6x8x128xf32, #tpu.memory_space<vmem>>, vector<1x8x128xf32>
    %5 = vector.shape_cast %4 : vector<1x8x128xf32> to vector<8x128xf32>
    %c3 = arith.constant 3 : index
    %c0_6 = arith.constant 0 : index
    %c0_7 = arith.constant 0 : index
    %6 = vector.load %arg1[%c3, %c0_6, %c0_7] : memref<6x8x128xf32, #tpu.memory_space<vmem>>, vector<1x8x128xf32>
    %7 = vector.shape_cast %6 : vector<1x8x128xf32> to vector<8x128xf32>
    %c4 = arith.constant 4 : index
    %c0_8 = arith.constant 0 : index
    %c0_9 = arith.constant 0 : index
    %8 = vector.load %arg1[%c4, %c0_8, %c0_9] : memref<6x8x128xf32, #tpu.memory_space<vmem>>, vector<1x8x128xf32>
    %9 = vector.shape_cast %8 : vector<1x8x128xf32> to vector<8x128xf32>
    %c5 = arith.constant 5 : index
    %c0_10 = arith.constant 0 : index
    %c0_11 = arith.constant 0 : index
    %10 = vector.load %arg1[%c5, %c0_10, %c0_11] : memref<6x8x128xf32, #tpu.memory_space<vmem>>, vector<1x8x128xf32>
    %11 = vector.shape_cast %10 : vector<1x8x128xf32> to vector<8x128xf32>
    %12 = math.cos %3 : vector<8x128xf32>
    %13 = math.sin %3 : vector<8x128xf32>
    %14 = tpu.reciprocal %1 {approx = true} : vector<8x128xf32> -> vector<8x128xf32>
    %15 = arith.mulf %1, %14 : vector<8x128xf32>
    %cst = arith.constant 2.000000e+00 : f32
    %16 = vector.broadcast %cst : f32 to vector<8x128xf32>
    %17 = arith.subf %16, %15 : vector<8x128xf32>
    %18 = arith.mulf %14, %17 : vector<8x128xf32>
    %19 = arith.mulf %12, %18 : vector<8x128xf32>
    %20 = arith.mulf %13, %18 : vector<8x128xf32>
    %21 = arith.mulf %20, %7 : vector<8x128xf32>
    %22 = arith.mulf %19, %9 : vector<8x128xf32>
    %23 = arith.subf %21, %22 : vector<8x128xf32>
    %24 = arith.mulf %12, %7 : vector<8x128xf32>
    %25 = arith.mulf %13, %9 : vector<8x128xf32>
    %26 = arith.addf %24, %25 : vector<8x128xf32>
    %cst_12 = arith.constant 5.000000e-02 : f32
    %27 = vector.broadcast %cst_12 : f32 to vector<8x128xf32>
    %28 = arith.mulf %26, %27 : vector<8x128xf32>
    %29 = arith.subf %1, %28 : vector<8x128xf32>
    %c0_13 = arith.constant 0 : index
    %c0_14 = arith.constant 0 : index
    %c0_15 = arith.constant 0 : index
    %30 = vector.load %arg2[%c0_13, %c0_14, %c0_15] : memref<3x8x128xf32, #tpu.memory_space<vmem>>, vector<1x8x128xf32>
    %31 = vector.shape_cast %30 : vector<1x8x128xf32> to vector<8x128xf32>
    %32 = vector.shape_cast %29 : vector<8x128xf32> to vector<1x8x128xf32>
    tpu.vector_store %arg2[%c0_13, %c0_14, %c0_15], %32 {strides = array<i32>} : memref<3x8x128xf32, #tpu.memory_space<vmem>>, vector<1x8x128xf32>,
    %33 = arith.subf %23, %11 : vector<8x128xf32>
    %cst_16 = arith.constant 5.000000e-02 : f32
    %34 = vector.broadcast %cst_16 : f32 to vector<8x128xf32>
    %35 = arith.mulf %33, %34 : vector<8x128xf32>
    %36 = arith.addf %3, %35 : vector<8x128xf32>
    %c1_17 = arith.constant 1 : index
    %c0_18 = arith.constant 0 : index
    %c0_19 = arith.constant 0 : index
    %37 = vector.load %arg2[%c1_17, %c0_18, %c0_19] : memref<3x8x128xf32, #tpu.memory_space<vmem>>, vector<1x8x128xf32>
    %38 = vector.shape_cast %37 : vector<1x8x128xf32> to vector<8x128xf32>
    %39 = vector.shape_cast %36 : vector<8x128xf32> to vector<1x8x128xf32>
    tpu.vector_store %arg2[%c1_17, %c0_18, %c0_19], %39 {strides = array<i32>} : memref<3x8x128xf32, #tpu.memory_space<vmem>>, vector<1x8x128xf32>,
    %cst_20 = arith.constant 5.000000e-02 : f32
    %40 = vector.broadcast %cst_20 : f32 to vector<8x128xf32>
    %41 = arith.mulf %23, %40 : vector<8x128xf32>
    %42 = arith.subf %5, %41 : vector<8x128xf32>
    %c2_21 = arith.constant 2 : index
    %c0_22 = arith.constant 0 : index
    %c0_23 = arith.constant 0 : index
    %43 = vector.load %arg2[%c2_21, %c0_22, %c0_23] : memref<3x8x128xf32, #tpu.memory_space<vmem>>, vector<1x8x128xf32>
    %44 = vector.shape_cast %43 : vector<1x8x128xf32> to vector<8x128xf32>
    %45 = vector.shape_cast %42 : vector<8x128xf32> to vector<1x8x128xf32>
    tpu.vector_store %arg2[%c2_21, %c0_22, %c0_23], %45 {strides = array<i32>} : memref<3x8x128xf32, #tpu.memory_space<vmem>>, vector<1x8x128xf32>,
    return
  }
  func.func @transform_0(%arg0: i32) -> (i32, i32, i32) {
    %c0_i32 = arith.constant 0 : i32
    %c0_i32_0 = arith.constant 0 : i32
    %c0_i32_1 = arith.constant 0 : i32
    return %c0_i32, %arg0, %c0_i32_0 : i32, i32, i32
  }
  func.func @transform_1(%arg0: i32) -> (i32, i32, i32) {
    %c0_i32 = arith.constant 0 : i32
    %c0_i32_0 = arith.constant 0 : i32
    %c0_i32_1 = arith.constant 0 : i32
    return %c0_i32, %arg0, %c0_i32_0 : i32, i32, i32
  }
}

</mosaic_0001>

<bundles_post_ra>
// kernel: tpu_custom_call.1
= control target key start
LH: loop header
LB: loop body
LE: loop exit
PB: predicated region body
PF: predicated region fallthrough
CT: control target
= control target key end

     0   :  { %6 = vsyncpa [#allocation3], 0  ;;  %s544_s0 = inlined_call_operand.hbm [shape: f32[6,8,128], index: 0, kind: input, shape index: {}]   ;;  %s545_s1 = inlined_call_operand.hbm [shape: f32[3,8,128], index: 1, kind: output, shape index: {}]  }
   0x1   :  { %7 = vsyncpa [#allocation4], 0  ;;  %s12_s8 = sshll.u32 %s544_s0, 4  ;;  %s459_s9 = smov [#allocation2]   ;;  %s13_s8 = int_to_ptr.hbm [resolvable:$true] %s12_s8 }
   0x2   :  { %s14_s10 = sshll.u32 %s459_s9, 4  ;;  %s460_s11 = smov 128   ;;  %s15_s10 = int_to_ptr.vmem [resolvable:$true] %s14_s10 }
   0x3   :  { %s461_s12 = smov 8  }
   0x4   :  { %20 = dma.hbm_to_vmem [thread:$0]  %s13_s8, 768, %s15_s10, [#allocation3], %s460_s11, %s460_s11, %s461_s12  }
   0x5   :  { %455 = dma.done.wait [#allocation3], 768  }
   0x6   :  { %456 = vsyncadd [#allocation3], 4294966528  ;;  %v486_v0 = vld [vmem:[#allocation2 + $0x8] sm:$0xff]  ;;  %v462_v12 = vmov 683565275   ;;  %s469_s0 = smov [#allocation5]  }
   0x7   :  { %v39_v1 = vand.u32 2139095040, %v486_v0  ;;  %v36_v3 = vand.u32 2147483647, %v486_v0  ;;  %v463_v14 = vmov 2475754826   ;;  %vm38_vm12 = vcmp.lt.s32.totalorder %v486_v0, 0 }
   0x8   :  { %v464_v16 = vmov 2131351028   ;;  %v465_v18 = vmov 2102212464   ;;  %v466_v20 = vmov 920167782  }
   0x9   :  { %v40_v2 = vshrl.u32 %v39_v1, 23  ;;  %v43_v6 = vand.u32 8388607, %v36_v3  ;;  %v467_v26 = vmov 1326507024   ;;  %v468_v1 = vmov 0  }
   0xa   :  { %vm37_vm13 = vcmp.le.f32.partialorder %v36_v3, 0.7853982  ;;  %s373_s13 = sshll.u32 %s469_s0, 4  ;;  %s375_s16 = sshll.u32 %s545_s1, 4  ;;  %s374_s13 = int_to_ptr.vmem [resolvable:$true] %s373_s13  ;;  %s376_s16 = int_to_ptr.hbm [resolvable:$true] %s375_s16 }
   0xb   :  { %v388_v4 = vadd.s32 4294967169, %v40_v2  ;;  %v44_v9 = vor.u32 8388608, %v43_v6 }
   0xd   :  { %v46_v5 = vadd.s32 1, %v388_v4  ;;  %v495_v28 = vshll.u32 %v44_v9, 8 }
   0xf   :  { %vm47_vm0 = vcmp.gt.s32.totalorder %v46_v5, 0  ;;  %v85_v40 = vand.u32 65535, %v495_v28  ;;  %v86_v41 = vshrl.u32 %v495_v28, 16 }
  0x10   :  { %v48_v7 = vsel %vm47_vm0, %v46_v5, 0 }
  0x11   :  { %v50_v8 = vand.u32 31, %v48_v7  ;;  %v492_v10 = vshrl.u32 %v48_v7, 5 }
  0x13   :  { %v51_v11 = vsub.s32 32, %v50_v8  ;;  %v53_v13 = vshll.u32 %v462_v12, %v50_v8  ;;  %v56_v15 = vshll.u32 %v463_v14, %v50_v8  ;;  %v59_v17 = vshll.u32 %v464_v16, %v50_v8 }
  0x14   :  { %v62_v19 = vshll.u32 %v465_v18, %v50_v8  ;;  %v65_v21 = vshll.u32 %v466_v20, %v50_v8  ;;  %vm68_vm1 = vcmp.lt.s32.totalorder %v492_v10, 1  ;;  %vm71_vm2 = vcmp.lt.s32.totalorder %v492_v10, 4 }
  0x15   :  { %v54_v22 = vshrl.u32 %v463_v14, %v51_v11  ;;  %v57_v23 = vshrl.u32 %v464_v16, %v51_v11  ;;  %v60_v24 = vshrl.u32 %v465_v18, %v51_v11  ;;  %v63_v25 = vshrl.u32 %v466_v20, %v51_v11 }
  0x16   :  { %v66_v27 = vshrl.u32 %v467_v26, %v51_v11  ;;  %vm70_vm3 = vcmp.lt.s32.totalorder %v492_v10, 3  ;;  %vm69_vm4 = vcmp.lt.s32.totalorder %v492_v10, 2  ;;  %v52_v48 = vshrl.u32 %v462_v12, %v51_v11 }
  0x17   :  { %v55_v29 = vor.u32 %v54_v22, %v53_v13  ;;  %v58_v30 = vor.u32 %v57_v23, %v56_v15  ;;  %v61_v31 = vor.u32 %v60_v24, %v59_v17  ;;  %v64_v32 = vor.u32 %v63_v25, %v62_v19 }
  0x18   :  { %v67_v33 = vor.u32 %v66_v27, %v65_v21 }
  0x19   :  { %v76_v34 = vsel %vm68_vm1, %v55_v29, %v58_v30  ;;  %v80_v35 = vsel %vm68_vm1, %v58_v30, %v61_v31  ;;  %v77_v36 = vsel %vm71_vm2, %v64_v32, 920167782  ;;  %v72_v61 = vsel %vm68_vm1, %v52_v48, %v55_v29 }
  0x1a   :  { %v81_v37 = vsel %vm71_vm2, %v67_v33, 1326507024  ;;  %v78_v38 = vsel %vm70_vm3, %v61_v31, %v77_v36  ;;  %v73_v63 = vsel %vm71_vm2, %v61_v31, 2102212464 }
  0x1b   :  { %v82_v39 = vsel %vm70_vm3, %v64_v32, %v81_v37  ;;  %v79_v42 = vsel %vm69_vm4, %v76_v34, %v78_v38  ;;  %v74_v12 = vsel %vm70_vm3, %v58_v30, %v73_v63 }
  0x1c   :  { %v83_v43 = vsel %vm69_vm4, %v80_v35, %v82_v39  ;;  %v109_v46 = vand.u32 65535, %v79_v42  ;;  %v110_v47 = vshrl.u32 %v79_v42, 16  ;;  %v75_v20 = vsel %vm69_vm4, %v72_v61, %v74_v12 }
  0x1d   :  { %v87_v44 = vand.u32 65535, %v83_v43  ;;  %v88_v45 = vshrl.u32 %v83_v43, 16  ;;  %v129_v24 = vmul.u32 %v495_v28, %v75_v20  ;;  %vm179_vm4 = vweird.f32 %v486_v0 }
  0x1e   :  { %v111_v52 = vmul.u32 %v109_v46, %v85_v40  ;;  %v112_v53 = vmul.u32 %v110_v47, %v85_v40  ;;  %v113_v54 = vmul.u32 %v109_v46, %v86_v41  ;;  %v114_v58 = vmul.u32 %v110_v47, %v86_v41 }
  0x1f   :  { %v89_v49 = vmul.u32 %v87_v44, %v85_v40  ;;  %v90_v50 = vmul.u32 %v88_v45, %v85_v40  ;;  %v91_v51 = vmul.u32 %v87_v44, %v86_v41  ;;  %v92_v55 = vmul.u32 %v88_v45, %v86_v41 }
  0x20   :  { %v115_v59 = vshll.u32 %v112_v53, 16  ;;  %v117_v60 = vshll.u32 %v113_v54, 16  ;;  %v116_v9 = vshrl.u32 %v112_v53, 16  ;;  %v118_v16 = vshrl.u32 %v113_v54, 16 }
  0x21   :  { %v93_v56 = vshll.u32 %v90_v50, 16  ;;  %v95_v57 = vshll.u32 %v91_v51, 16  ;;  %v94_v5 = vshrl.u32 %v90_v50, 16  ;;  %v96_v13 = vshrl.u32 %v91_v51, 16  ;;  %v530_v50 = vld [vmem:[#allocation2] sm:$0xff] }
  0x22   :  { %vm119_vm6 = vc.u32 %v111_v52, %v115_v59  ;;  %v121_v4 = vadd.s32 %v115_v59, %v111_v52  ;;  %405 = vrcp.f32 %v530_v50 }
  0x23   :  { %vm97_vm5 = vc.u32 %v89_v49, %v93_v56  ;;  %v99_v62 = vadd.s32 %v93_v56, %v89_v49  ;;  %v120_v7 = vsel %vm119_vm6, 1, %v468_v1 }
  0x24   :  { %v98_v2 = vsel %vm97_vm5, 1, %v468_v1  ;;  %v122_v11 = vadd.s32 %v120_v7, %v114_v58  ;;  %vm123_vm8 = vc.u32 %v121_v4, %v117_v60  ;;  %v125_v19 = vadd.s32 %v121_v4, %v117_v60 }
  0x25   :  { %v100_v6 = vadd.s32 %v98_v2, %v92_v55  ;;  %vm101_vm7 = vc.u32 %v99_v62, %v95_v57  ;;  %v124_v15 = vsel %vm123_vm8, 1, %v468_v1 }
  0x26   :  { %v102_v8 = vsel %vm101_vm7, 1, %v468_v1  ;;  %v126_v17 = vadd.s32 %v124_v15, %v122_v11 }
  0x27   :  { %v104_v14 = vadd.s32 %v102_v8, %v100_v6 }
  0x28   :  { %v127_v21 = vadd.s32 %v126_v17, %v116_v9  ;;  %v406_v61 = vpop.eup %405 }
  0x29   :  { %v105_v18 = vadd.s32 %v104_v14, %v94_v5  ;;  %v346_v5 = vmul.f32 %v406_v61, %v530_v50 }
  0x2a   :  { %v128_v23 = vadd.s32 %v127_v21, %v118_v16 }
  0x2b   :  { %v106_v22 = vadd.s32 %v105_v18, %v96_v13  ;;  %v347_v11 = vsub.f32 2.0, %v346_v5 }
  0x2c   :  { %v132_v25 = vadd.s32 1, %v128_v23 }
  0x2d   :  { %vm131_vm9 = vc.u32 %v106_v22, %v125_v19  ;;  %v130_v10 = vadd.s32 %v125_v19, %v106_v22  ;;  %v348_v17 = vmul.f32 %v406_v61, %v347_v11  ;;  %v31_v22 = vld [vmem:[#allocation2 + $0x18] sm:$0xff] }
  0x2e   :  { %v133_v26 = vsel %vm131_vm9, %v132_v25, %v128_v23  ;;  %v33_v23 = vld [vmem:[#allocation2 + $0x20] sm:$0xff] }
  0x2f   :  { %v134_v27 = vadd.s32 %v133_v26, %v129_v24 }
  0x31   :  { %v135_v29 = vadd.s32 536870912, %v134_v27 }
  0x33   :  { %v136_v30 = vshrl.u32 %v135_v29, 30 }
  0x35   :  { %v137_v31 = vshll.u32 %v136_v30, 30  ;;  %v160_v48 = vsub.s32 4, %v136_v30 }
  0x37   :  { %v138_v32 = vsub.s32 %v134_v27, %v137_v31  ;;  %v161_v52 = vsel %vm38_vm12, %v160_v48, %v136_v30 }
  0x38   :  { %v163_v55 = vsel %vm37_vm13, 0, %v161_v52 }
  0x39   :  { %vm139_vm10 = vcmp.lt.s32.totalorder %v138_v32, 0  ;;  %v140_v33 = vsub.s32 0, %v138_v32  ;;  %v334_v60 = vadd.s32 3, %v163_v55  ;;  %v180_v2 = vand.u32 3, %v163_v55 }
  0x3b   :  { %v141_v34 = vsel %vm139_vm10, %v140_v33, %v138_v32  ;;  %v335_v4 = vand.u32 3, %v334_v60  ;;  %vm185_vm14 = vcmp.eq.s32.totalorder %v180_v2, 2  ;;  %vm181_vm0 = vcmp.lt.s32.totalorder %v180_v2, 2 }
  0x3c   :  { %v142_v35 = vclz %v141_v34  ;;  %vm182_vm1 = vcmp.eq.s32.totalorder %v180_v2, 0  ;;  %v35_v34 = vld [vmem:[#allocation2 + $0x28] sm:$0xff] }
  0x3d   :  { %vm340_vm15 = vcmp.eq.s32.totalorder %v335_v4, 2  ;;  %vm337_vm2 = vcmp.eq.s32.totalorder %v335_v4, 0  ;;  %vm336_vm3 = vcmp.lt.s32.totalorder %v335_v4, 2 }
  0x3e   :  { %v389_v36 = vadd.s32 4294967294, %v142_v35 }
  0x40   :  { %vm390_vm11 = vcmp.lt.s32.totalorder %v389_v36, 0 }
  0x41   :  { %v145_v37 = vsel %vm390_vm11, 0, %v389_v36 }
  0x42   :  { %v146_v38 = vsub.s32 32, %v145_v37  ;;  %v147_v39 = vshll.u32 %v138_v32, %v145_v37  ;;  %v150_v40 = vsub.s32 4294967266, %v145_v37 }
  0x44   :  { %v148_v28 = vshrl.u32 %v130_v10, %v146_v38  ;;  %v151_v41 = vadd.s32 127, %v150_v40  ;;  %v29_v10 = vld [vmem:[#allocation2 + $0x10] sm:$0xff] }
  0x46   :  { %v149_v42 = vor.u32 %v148_v28, %v147_v39  ;;  %v152_v43 = vshll.u32 %v151_v41, 23 }
  0x48   :  { %v153_v44 = vor.u32 4788187, %v152_v43  ;;  %v156_v45 = vcvt.s32.f32 %v149_v42 }
  0x4a   :  { %v154_v46 = vand.u32 2147483647, %v153_v44 }
  0x4c   :  { %v157_v47 = vmul.f32 %v156_v45, %v154_v46 }
  0x4e   :  { %v158_v49 = vxor.u32 2147483648, %v157_v47 }
  0x50   :  { %v159_v51 = vsel %vm38_vm12, %v158_v49, %v157_v47 }
  0x51   :  { %v162_v53 = vsel %vm37_vm13, %v486_v0, %v159_v51 }
  0x52   :  { %v164_v54 = vmul.f32 %v162_v53, %v162_v53 }
  0x54   :  { %v165_v56 = vmul.f32 -0.001358992, %v164_v54  ;;  %v172_v57 = vmul.f32 -0.00019511016, %v164_v54 }
  0x56   :  { %v166_v58 = vadd.f32 0.041655596, %v165_v56  ;;  %v173_v59 = vadd.f32 0.008332121, %v172_v57 }
  0x58   :  { %v167_v62 = vmul.f32 %v166_v58, %v164_v54  ;;  %v174_v63 = vmul.f32 %v173_v59, %v164_v54 }
  0x5a   :  { %v168_v3 = vadd.f32 -0.4999988, %v167_v62  ;;  %v175_v1 = vadd.f32 -0.16666654, %v174_v63 }
  0x5c   :  { %v169_v6 = vmul.f32 %v168_v3, %v164_v54  ;;  %v176_v7 = vmul.f32 %v175_v1, %v164_v54 }
  0x5e   :  { %v170_v8 = vadd.f32 1.0, %v169_v6  ;;  %v177_v9 = vadd.f32 1.0, %v176_v7 }
  0x60   :  { %v178_v12 = vmul.f32 %v177_v9, %v162_v53  ;;  %v186_v13 = vxor.u32 2147483648, %v170_v8 }
  0x62   :  { %v183_v14 = vxor.u32 2147483648, %v178_v12  ;;  %v187_v15 = vsel %vm185_vm14, %v186_v13, %v178_v12  ;;  %v342_v16 = vsel %vm340_vm15, %v186_v13, %v178_v12 }
  0x64   :  { %v184_v18 = vsel %vm182_vm1, %v170_v8, %v183_v14  ;;  %v339_v19 = vsel %vm337_vm2, %v170_v8, %v183_v14 }
  0x65   :  { %v188_v20 = vsel %vm181_vm0, %v184_v18, %v187_v15  ;;  %v343_v21 = vsel %vm336_vm3, %v339_v19, %v342_v16 }
  0x66   :  { %v189_v24 = vsel %vm179_vm4, nan, %v188_v20  ;;  %v344_v25 = vsel %vm179_vm4, nan, %v343_v21 }
  0x67   :  { %v349_v26 = vmul.f32 %v348_v17, %v189_v24  ;;  %v350_v27 = vmul.f32 %v348_v17, %v344_v25  ;;  %v354_v29 = vmul.f32 %v189_v24, %v31_v22  ;;  %v355_v30 = vmul.f32 %v344_v25, %v33_v23 }
  0x69   :  { %v356_v31 = vadd.f32 %v355_v30, %v354_v29  ;;  %v351_v32 = vmul.f32 %v350_v27, %v31_v22  ;;  %v352_v33 = vmul.f32 %v349_v26, %v33_v23 }
  0x6b   :  { %v357_v35 = vmul.f32 0.05, %v356_v31  ;;  %v353_v36 = vsub.f32 %v351_v32, %v352_v33 }
  0x6d   :  { %v358_v37 = vsub.f32 %v530_v50, %v357_v35  ;;  %v360_v38 = vsub.f32 %v353_v36, %v35_v34  ;;  %v365_v39 = vmul.f32 0.05, %v353_v36 }
  0x6f   :  { %359 = vst [vmem:[#allocation5] sm:$0xff] %v358_v37  ;;  %v361_v40 = vmul.f32 0.05, %v360_v38  ;;  %v366_v28 = vsub.f32 %v29_v10, %v365_v39 }
  0x71   :  { %v362_v41 = vadd.f32 %v361_v40, %v486_v0  ;;  %368 = vst [vmem:[#allocation5 + $0x10] sm:$0xff] %v366_v28 }
  0x73   :  { %364 = vst [vmem:[#allocation5 + $0x8] sm:$0xff] %v362_v41 }
  0x74   :  { %381 = dma.vmem_to_hbm [thread:$0]  %s374_s13, 384, %s376_s16, [#allocation4], %s460_s11, %s460_s11, %s461_s12  }
  0x75   :  { %457 = dma.done.wait [#allocation4], 384  }
  0x76   :  { %458 = vsyncadd [#allocation4], 4294966912 }
  0x77   :  { %386 = vsyncpa [#allocation3], 1 }
  0x78   :  { %387 = vsyncpa [#allocation4], 1 }

</bundles_post_ra>
